<compile_context>
chip_gen: v7x
topology: tpu7x:2x2x1
jax: 0.10.0
libtpu: 0.0.40
codegen_flags: <defaults>
</compile_context>

<pallas_src>
import jax
import jax.numpy as jnp
from jax import lax
from jax.experimental import pallas as pl
from jax.experimental.pallas import tpu as pltpu


def _tournament_max_argmax(nodes):
    """Pairwise (max, argmax) tournament; strict '>' keeps the first occurrence."""
    while len(nodes) > 1:
        merged = []
        for a in range(0, len(nodes) - 1, 2):
            av, ai = nodes[a]
            bv, bi = nodes[a + 1]
            upd = bv > av                       # strict: lower (earlier) index wins ties
            merged.append((jnp.where(upd, bv, av), jnp.where(upd, bi, ai)))
        if len(nodes) % 2:
            merged.append(nodes[-1])
        nodes = merged
    return nodes[0]


def _crf_viterbi_kernel(em_ref, mask_ref, trans_ref, end_ref, tags_ref,
                        score_ref, hist_ref, bl_ref, transb_ref):
    """Viterbi DP + in-kernel back-tracking for one batch tile (batch on lanes).

    em_ref    : (S, T, TB) f32 emissions (start_transitions folded into t=0)
    mask_ref  : (S, 1, TB) f32 mask (>0 => valid step)
    trans_ref : (T, T, 1)  f32 transitions[prev, next]
    end_ref   : (T, 1)     f32 end transitions
    tags_ref  : (S, 1, TB) i32 output best-tag sequence (CRF.forward semantics)
    score_ref : (T, TB)    f32 scratch: running (gated) Viterbi score
    hist_ref  : (S, T, TB) i32 scratch: hist[t][n, b] = best prev tag into (t, n, b)
    bl_ref    : (1, TB)    i32 scratch: current back-tracked tag
    transb_ref: (T, T, TB) f32 scratch: hoisted lane-broadcast transition rows
    """
    S = em_ref.shape[0]
    T, TB = score_ref.shape

    # ---- hoist the loop-invariant lane-broadcasts of the transition rows ------
    for p in range(T):                                  # static unroll, done once
        transb_ref[p] = jnp.broadcast_to(trans_ref[p], (T, TB))

    # ---- t = 0 : score = start_transitions + emissions[0] (start folded) ------
    score_ref[...] = em_ref[0]

    # ---- forward Viterbi recursion (whole sequence resident in VMEM) ----------
    @pl.loop(1, S)
    def _dp(t):
        score = score_ref[...]                          # (T_prev, TB)
        em_t = em_ref[t]                                # (T_next, TB)
        nodes = []
        for p in range(T):                              # static unroll over prev tags
            # ((score[p] broadcast over next tags) + transitions[p, :]) + emissions[t]
            # -- same association as the reference, for bit-exact scores.
            cand = (jnp.broadcast_to(score[p:p + 1, :], (T, TB))
                    + transb_ref[p]) + em_t
            nodes.append((cand, jnp.full((), p, jnp.int32)))
        best, idx = _tournament_max_argmax(nodes)       # depth ceil(log2 T)
        hist_ref[t] = jnp.broadcast_to(idx, (T, TB))    # ungated, exactly like the module
        m = mask_ref[t]                                 # (1, TB)
        score_ref[...] = jnp.where(m > 0.0, best, score)

    # ---- finalize: add end transitions, pick the best last tag ----------------
    fscore = score_ref[...] + jnp.broadcast_to(end_ref[...], (T, TB))
    fnodes = [(fscore[p:p + 1, :], jnp.full((), p, jnp.int32)) for p in range(T)]
    _, best_last = _tournament_max_argmax(fnodes)
    best_last = jnp.broadcast_to(best_last, (1, TB))    # (1, TB) i32
    bl_ref[...] = best_last
    tags_ref[S - 1] = best_last                         # single lane-dense row write

    # ---- in-kernel back-tracking (history never leaves VMEM) ------------------
    sub_iota = lax.broadcasted_iota(jnp.int32, (T, TB), 0)   # tag id per sublane row

    @pl.loop(0, S - 1)
    def _bt(k):
        i = (S - 2) - k                                 # fill time step i = S-2 .. 0
        bl = bl_ref[...]                                # (1, TB)
        h = hist_ref[i + 1]                             # (T, TB)
        # integer one-hot gather over the sublane (tag) axis -- no float round-trip
        new_bl = jnp.sum(jnp.where(sub_iota == bl, h, 0),
                         axis=0, keepdims=True)          # (1, TB) i32
        bl_ref[...] = new_bl
        tags_ref[i] = new_bl                            # one row write per step


def crf_forward(emissions, mask, start_transitions, end_transitions, transitions,
                *, batch_first=False, batch_tile=None):
    """Pallas equivalent of CRF.forward(): returns (batch, seq_len) int32 best tags."""
    emissions = jnp.asarray(emissions)
    if batch_first:
        emissions = jnp.swapaxes(emissions, 0, 1)
        if mask is not None:
            mask = jnp.swapaxes(jnp.asarray(mask), 0, 1)
    S, B, T = emissions.shape
    if mask is None:
        mask = jnp.ones((S, B), dtype=jnp.uint8)
    mask = jnp.asarray(mask)

    # --------------------- VMEM-aware batch-tile selection ---------------------
    def _round_up(x, m):
        return ((x + m - 1) // m) * m

    try:
        vmem_cap = int(pltpu.get_tpu_info().vmem_capacity_bytes)
    except Exception:
        vmem_cap = 64 * 1024 * 1024           # conservative (v7x per-TC VMEM)
    vmem_budget = vmem_cap - 8 * 1024 * 1024  # headroom for Mosaic internal scratch

    Tp = _round_up(T, 8)                      # sublane padding of the tag axis

    def _vmem_need(tb):
        em = 2 * S * Tp * tb * 4              # emissions blocks (double-buffered)
        mk = 2 * S * 8 * tb * 4               # mask blocks ((S,1,TB) pads sublanes to 8)
        ob = 2 * S * 8 * tb * 4               # output tag blocks
        hist = S * Tp * tb * 4                # history scratch (stays in VMEM)
        misc = (T * Tp * tb + 2 * Tp * tb + 8 * tb + Tp * Tp + Tp) * 4
        return em + mk + ob + hist + misc

    if batch_tile is None:
        b128 = _round_up(B, 128)
        # lane width so each cmp/select stage of the serial recursion covers
        # ~8 vregs of f32 work (T * TB >= 8192); multiple of 128, capped at 1024.
        tb = max(128, min(1024, _round_up(-(-8192 // max(T, 1)), 128)))
        tb = min(tb, b128)
        if tb == b128 and b128 >= 256:        # give v7x's two TensorCores >=2 tiles
            tb = max(128, (b128 // 2) // 128 * 128)
        while tb > 128 and _vmem_need(tb) > vmem_budget:
            tb -= 128
        TB = tb
    else:
        TB = int(batch_tile)
        assert TB % 128 == 0, "batch_tile must be a multiple of 128"
    # TODO(synk): for extremely long sequences where even TB=128 overflows VMEM,
    # add an "arbitrary" time-block grid axis instead of keeping S resident.

    B_pad = _round_up(B, TB)
    grid = B_pad // TB

    # -------------- data layout: batch on lanes, tags on sublanes --------------
    em = emissions.astype(jnp.float32)
    em = em.at[0].add(jnp.asarray(start_transitions, jnp.float32)[None, :])  # fold start
    em = jnp.swapaxes(em, 1, 2)                                   # (S, T, B)
    mask3 = mask.astype(jnp.float32)[:, None, :]                  # (S, 1, B)
    if B_pad != B:
        em = jnp.pad(em, ((0, 0), (0, 0), (0, B_pad - B)))
        mask3 = jnp.pad(mask3, ((0, 0), (0, 0), (0, B_pad - B)))
    trans3 = jnp.asarray(transitions, jnp.float32).reshape(T, T, 1)
    end2 = jnp.asarray(end_transitions, jnp.float32).reshape(T, 1)

    compiler_kwargs = dict(dimension_semantics=("parallel",))
    need = _vmem_need(TB)
    if need > 12 * 1024 * 1024:
        compiler_kwargs["vmem_limit_bytes"] = int(
            min(max(need * 5 // 4, 16 * 1024 * 1024), vmem_cap - 4 * 1024 * 1024))

    tags_stb = pl.pallas_call(
        _crf_viterbi_kernel,
        out_shape=jax.ShapeDtypeStruct((S, 1, B_pad), jnp.int32),
        grid_spec=pltpu.PrefetchScalarGridSpec(
            num_scalar_prefetch=0,
            grid=(grid,),
            in_specs=[
                pl.BlockSpec((S, T, TB), lambda b: (0, 0, b)),    # emissions (whole seq)
                pl.BlockSpec((S, 1, TB), lambda b: (0, 0, b)),    # mask (whole seq)
                pl.BlockSpec((T, T, 1), lambda b: (0, 0, 0)),     # transitions[prev, next]
                pl.BlockSpec((T, 1), lambda b: (0, 0)),           # end transitions
            ],
            out_specs=pl.BlockSpec((S, 1, TB), lambda b: (0, 0, b)),
            scratch_shapes=[
                pltpu.VMEM((T, TB), jnp.float32),                 # running Viterbi score
                pltpu.VMEM((S, T, TB), jnp.int32),                # history (VMEM-resident)
                pltpu.VMEM((1, TB), jnp.int32),                   # back-tracking carry
                pltpu.VMEM((T, T, TB), jnp.float32),              # hoisted transition rows
            ],
        ),
        compiler_params=pltpu.CompilerParams(**compiler_kwargs),
    )(em, mask3, trans3, end2)

    # (S, 1, B_pad) -> (B, S), dropping the padded batch lanes
    return jnp.swapaxes(tags_stb[:, 0, :B], 0, 1)


def _reference_forward(emissions, mask, start, end, transitions):
    """Pure-JAX mirror of the PyTorch module's forward(), for verification."""
    S, B, T = emissions.shape
    score = start[None, :] + emissions[0]
    history = []
    for i in range(1, S):
        nxt = score[:, :, None] + transitions[None, :, :] + emissions[i][:, None, :]
        best = jnp.max(nxt, axis=1)
        idx = jnp.argmax(nxt, axis=1)
        score = jnp.where(mask[i][:, None] > 0, best, score)
        history.append(idx)
    score = score + end[None, :]
    best_last = jnp.argmax(score, axis=1)
    tags = [best_last]
    for i in reversed(range(S - 1)):
        best_last = history[i][jnp.arange(B), tags[-1]]
        tags.append(best_last)
    return jnp.stack(tags[::-1], axis=1).astype(jnp.int32)


if __name__ == "__main__":
    key = jax.random.PRNGKey(0)
    k_em, k_start, k_end, k_trans = jax.random.split(key, 4)

    S, B, T = 8, 4, 8  # seq_len, batch, num_tags

    emissions = jax.random.normal(k_em, (S, B, T), dtype=jnp.float32)
    # ragged prefix mask per batch element (uint8, like torch.ByteTensor)
    lengths = jnp.array([8, 6, 5, 8], dtype=jnp.int32)
    mask = (jnp.arange(S)[:, None] < lengths[None, :]).astype(jnp.uint8)  # (S, B)

    start_transitions = jax.random.normal(k_start, (T,), dtype=jnp.float32)
    end_transitions = jax.random.normal(k_end, (T,), dtype=jnp.float32)
    transitions = jax.random.normal(k_trans, (T, T), dtype=jnp.float32)

    best_tags = crf_forward(emissions, mask, start_transitions,
                            end_transitions, transitions)
    best_tags = jax.block_until_ready(best_tags)

    ref_tags = _reference_forward(emissions, mask, start_transitions,
                                  end_transitions, transitions)

    assert best_tags.shape == (B, S)
    assert bool(jnp.all(best_tags == ref_tags))
    print("KERNEL_OK")
</pallas_src>

<mosaic_0001>
module attributes {stable_mosaic.version = 11 : i64} {
  func.func @_crf_viterbi_kernel(%arg0: i32, %arg1: memref<8x8x128xf32, #tpu.memory_space<vmem>>, %arg2: memref<8x1x128xf32, #tpu.memory_space<vmem>>, %arg3: memref<8x8x1xf32, #tpu.memory_space<vmem>>, %arg4: memref<8x1xf32, #tpu.memory_space<vmem>>, %arg5: memref<8x1x128xi32, #tpu.memory_space<vmem>>, %arg6: memref<8x128xf32, #tpu.memory_space<vmem>>, %arg7: memref<8x8x128xi32, #tpu.memory_space<vmem>>, %arg8: memref<1x128xi32, #tpu.memory_space<vmem>>, %arg9: memref<8x8x128xf32, #tpu.memory_space<vmem>>) attributes {dimension_semantics = [#tpu.dimension_semantics<parallel>], iteration_bounds = array<i64: 1>, scalar_prefetch = 0 : i64, scratch_operands = 4 : i64, tpu.core_type = #tpu.core_type<tc>, window_params = [{transform_indices = @transform_0, window_bounds = array<i64: 8, 8, 128>}, {transform_indices = @transform_1, window_bounds = array<i64: 8, 1, 128>}, {pipeline_mode = #tpu.pipeline_mode<synchronous>, transform_indices = @transform_2, window_bounds = array<i64: 8, 8, 1>}, {pipeline_mode = #tpu.pipeline_mode<synchronous>, transform_indices = @transform_3, window_bounds = array<i64: 8, 1>}, {transform_indices = @transform_4, window_bounds = array<i64: 8, 1, 128>}]} {
    %c0 = arith.constant 0 : index
    %c0_0 = arith.constant 0 : index
    %c0_1 = arith.constant 0 : index
    %0 = vector.load %arg3[%c0, %c0_0, %c0_1] : memref<8x8x1xf32, #tpu.memory_space<vmem>>, vector<1x8x1xf32>
    %1 = vector.shape_cast %0 : vector<1x8x1xf32> to vector<8x1xf32>
    %2 = vector.shape_cast %1 : vector<8x1xf32> to vector<8x1xf32>
    %3 = vector.broadcast %2 : vector<8x1xf32> to vector<8x128xf32>
    %c0_2 = arith.constant 0 : index
    %c0_3 = arith.constant 0 : index
    %c0_4 = arith.constant 0 : index
    %4 = vector.load %arg9[%c0_2, %c0_3, %c0_4] : memref<8x8x128xf32, #tpu.memory_space<vmem>>, vector<1x8x128xf32>
    %5 = vector.shape_cast %4 : vector<1x8x128xf32> to vector<8x128xf32>
    %6 = vector.shape_cast %3 : vector<8x128xf32> to vector<1x8x128xf32>
    tpu.vector_store %arg9[%c0_2, %c0_3, %c0_4], %6 {strides = array<i32>} : memref<8x8x128xf32, #tpu.memory_space<vmem>>, vector<1x8x128xf32>,
    %c1 = arith.constant 1 : index
    %c0_5 = arith.constant 0 : index
    %c0_6 = arith.constant 0 : index
    %7 = vector.load %arg3[%c1, %c0_5, %c0_6] : memref<8x8x1xf32, #tpu.memory_space<vmem>>, vector<1x8x1xf32>
    %8 = vector.shape_cast %7 : vector<1x8x1xf32> to vector<8x1xf32>
    %9 = vector.shape_cast %8 : vector<8x1xf32> to vector<8x1xf32>
    %10 = vector.broadcast %9 : vector<8x1xf32> to vector<8x128xf32>
    %c1_7 = arith.constant 1 : index
    %c0_8 = arith.constant 0 : index
    %c0_9 = arith.constant 0 : index
    %11 = vector.load %arg9[%c1_7, %c0_8, %c0_9] : memref<8x8x128xf32, #tpu.memory_space<vmem>>, vector<1x8x128xf32>
    %12 = vector.shape_cast %11 : vector<1x8x128xf32> to vector<8x128xf32>
    %13 = vector.shape_cast %10 : vector<8x128xf32> to vector<1x8x128xf32>
    tpu.vector_store %arg9[%c1_7, %c0_8, %c0_9], %13 {strides = array<i32>} : memref<8x8x128xf32, #tpu.memory_space<vmem>>, vector<1x8x128xf32>,
    %c2 = arith.constant 2 : index
    %c0_10 = arith.constant 0 : index
    %c0_11 = arith.constant 0 : index
    %14 = vector.load %arg3[%c2, %c0_10, %c0_11] : memref<8x8x1xf32, #tpu.memory_space<vmem>>, vector<1x8x1xf32>
    %15 = vector.shape_cast %14 : vector<1x8x1xf32> to vector<8x1xf32>
    %16 = vector.shape_cast %15 : vector<8x1xf32> to vector<8x1xf32>
    %17 = vector.broadcast %16 : vector<8x1xf32> to vector<8x128xf32>
    %c2_12 = arith.constant 2 : index
    %c0_13 = arith.constant 0 : index
    %c0_14 = arith.constant 0 : index
    %18 = vector.load %arg9[%c2_12, %c0_13, %c0_14] : memref<8x8x128xf32, #tpu.memory_space<vmem>>, vector<1x8x128xf32>
    %19 = vector.shape_cast %18 : vector<1x8x128xf32> to vector<8x128xf32>
    %20 = vector.shape_cast %17 : vector<8x128xf32> to vector<1x8x128xf32>
    tpu.vector_store %arg9[%c2_12, %c0_13, %c0_14], %20 {strides = array<i32>} : memref<8x8x128xf32, #tpu.memory_space<vmem>>, vector<1x8x128xf32>,
    %c3 = arith.constant 3 : index
    %c0_15 = arith.constant 0 : index
    %c0_16 = arith.constant 0 : index
    %21 = vector.load %arg3[%c3, %c0_15, %c0_16] : memref<8x8x1xf32, #tpu.memory_space<vmem>>, vector<1x8x1xf32>
    %22 = vector.shape_cast %21 : vector<1x8x1xf32> to vector<8x1xf32>
    %23 = vector.shape_cast %22 : vector<8x1xf32> to vector<8x1xf32>
    %24 = vector.broadcast %23 : vector<8x1xf32> to vector<8x128xf32>
    %c3_17 = arith.constant 3 : index
    %c0_18 = arith.constant 0 : index
    %c0_19 = arith.constant 0 : index
    %25 = vector.load %arg9[%c3_17, %c0_18, %c0_19] : memref<8x8x128xf32, #tpu.memory_space<vmem>>, vector<1x8x128xf32>
    %26 = vector.shape_cast %25 : vector<1x8x128xf32> to vector<8x128xf32>
    %27 = vector.shape_cast %24 : vector<8x128xf32> to vector<1x8x128xf32>
    tpu.vector_store %arg9[%c3_17, %c0_18, %c0_19], %27 {strides = array<i32>} : memref<8x8x128xf32, #tpu.memory_space<vmem>>, vector<1x8x128xf32>,
    %c4 = arith.constant 4 : index
    %c0_20 = arith.constant 0 : index
    %c0_21 = arith.constant 0 : index
    %28 = vector.load %arg3[%c4, %c0_20, %c0_21] : memref<8x8x1xf32, #tpu.memory_space<vmem>>, vector<1x8x1xf32>
    %29 = vector.shape_cast %28 : vector<1x8x1xf32> to vector<8x1xf32>
    %30 = vector.shape_cast %29 : vector<8x1xf32> to vector<8x1xf32>
    %31 = vector.broadcast %30 : vector<8x1xf32> to vector<8x128xf32>
    %c4_22 = arith.constant 4 : index
    %c0_23 = arith.constant 0 : index
    %c0_24 = arith.constant 0 : index
    %32 = vector.load %arg9[%c4_22, %c0_23, %c0_24] : memref<8x8x128xf32, #tpu.memory_space<vmem>>, vector<1x8x128xf32>
    %33 = vector.shape_cast %32 : vector<1x8x128xf32> to vector<8x128xf32>
    %34 = vector.shape_cast %31 : vector<8x128xf32> to vector<1x8x128xf32>
    tpu.vector_store %arg9[%c4_22, %c0_23, %c0_24], %34 {strides = array<i32>} : memref<8x8x128xf32, #tpu.memory_space<vmem>>, vector<1x8x128xf32>,
    %c5 = arith.constant 5 : index
    %c0_25 = arith.constant 0 : index
    %c0_26 = arith.constant 0 : index
    %35 = vector.load %arg3[%c5, %c0_25, %c0_26] : memref<8x8x1xf32, #tpu.memory_space<vmem>>, vector<1x8x1xf32>
    %36 = vector.shape_cast %35 : vector<1x8x1xf32> to vector<8x1xf32>
    %37 = vector.shape_cast %36 : vector<8x1xf32> to vector<8x1xf32>
    %38 = vector.broadcast %37 : vector<8x1xf32> to vector<8x128xf32>
    %c5_27 = arith.constant 5 : index
    %c0_28 = arith.constant 0 : index
    %c0_29 = arith.constant 0 : index
    %39 = vector.load %arg9[%c5_27, %c0_28, %c0_29] : memref<8x8x128xf32, #tpu.memory_space<vmem>>, vector<1x8x128xf32>
    %40 = vector.shape_cast %39 : vector<1x8x128xf32> to vector<8x128xf32>
    %41 = vector.shape_cast %38 : vector<8x128xf32> to vector<1x8x128xf32>
    tpu.vector_store %arg9[%c5_27, %c0_28, %c0_29], %41 {strides = array<i32>} : memref<8x8x128xf32, #tpu.memory_space<vmem>>, vector<1x8x128xf32>,
    %c6 = arith.constant 6 : index
    %c0_30 = arith.constant 0 : index
    %c0_31 = arith.constant 0 : index
    %42 = vector.load %arg3[%c6, %c0_30, %c0_31] : memref<8x8x1xf32, #tpu.memory_space<vmem>>, vector<1x8x1xf32>
    %43 = vector.shape_cast %42 : vector<1x8x1xf32> to vector<8x1xf32>
    %44 = vector.shape_cast %43 : vector<8x1xf32> to vector<8x1xf32>
    %45 = vector.broadcast %44 : vector<8x1xf32> to vector<8x128xf32>
    %c6_32 = arith.constant 6 : index
    %c0_33 = arith.constant 0 : index
    %c0_34 = arith.constant 0 : index
    %46 = vector.load %arg9[%c6_32, %c0_33, %c0_34] : memref<8x8x128xf32, #tpu.memory_space<vmem>>, vector<1x8x128xf32>
    %47 = vector.shape_cast %46 : vector<1x8x128xf32> to vector<8x128xf32>
    %48 = vector.shape_cast %45 : vector<8x128xf32> to vector<1x8x128xf32>
    tpu.vector_store %arg9[%c6_32, %c0_33, %c0_34], %48 {strides = array<i32>} : memref<8x8x128xf32, #tpu.memory_space<vmem>>, vector<1x8x128xf32>,
    %c7 = arith.constant 7 : index
    %c0_35 = arith.constant 0 : index
    %c0_36 = arith.constant 0 : index
    %49 = vector.load %arg3[%c7, %c0_35, %c0_36] : memref<8x8x1xf32, #tpu.memory_space<vmem>>, vector<1x8x1xf32>
    %50 = vector.shape_cast %49 : vector<1x8x1xf32> to vector<8x1xf32>
    %51 = vector.shape_cast %50 : vector<8x1xf32> to vector<8x1xf32>
    %52 = vector.broadcast %51 : vector<8x1xf32> to vector<8x128xf32>
    %c7_37 = arith.constant 7 : index
    %c0_38 = arith.constant 0 : index
    %c0_39 = arith.constant 0 : index
    %53 = vector.load %arg9[%c7_37, %c0_38, %c0_39] : memref<8x8x128xf32, #tpu.memory_space<vmem>>, vector<1x8x128xf32>
    %54 = vector.shape_cast %53 : vector<1x8x128xf32> to vector<8x128xf32>
    %55 = vector.shape_cast %52 : vector<8x128xf32> to vector<1x8x128xf32>
    tpu.vector_store %arg9[%c7_37, %c0_38, %c0_39], %55 {strides = array<i32>} : memref<8x8x128xf32, #tpu.memory_space<vmem>>, vector<1x8x128xf32>,
    %c0_40 = arith.constant 0 : index
    %c0_41 = arith.constant 0 : index
    %c0_42 = arith.constant 0 : index
    %56 = vector.load %arg1[%c0_40, %c0_41, %c0_42] : memref<8x8x128xf32, #tpu.memory_space<vmem>>, vector<1x8x128xf32>
    %57 = vector.shape_cast %56 : vector<1x8x128xf32> to vector<8x128xf32>
    %c0_43 = arith.constant 0 : index
    %c0_44 = arith.constant 0 : index
    %58 = vector.load %arg6[%c0_43, %c0_44] : memref<8x128xf32, #tpu.memory_space<vmem>>, vector<8x128xf32>
    tpu.vector_store %arg6[%c0_43, %c0_44], %57 {strides = array<i32>} : memref<8x128xf32, #tpu.memory_space<vmem>>, vector<8x128xf32>,
    %c0_i32 = arith.constant 0 : i32
    %c7_i32 = arith.constant 7 : i32
    %59 = arith.addi %c0_i32, %c7_i32 : i32
    %c1_i32 = arith.constant 1 : i32
    scf.for %arg10 = %c0_i32 to %59 step %c1_i32  : i32 {
      %c1_i32_62 = arith.constant 1 : i32
      %107 = arith.muli %arg10, %c1_i32_62 : i32
      %c1_i32_63 = arith.constant 1 : i32
      %108 = arith.addi %c1_i32_63, %107 : i32
      %c0_64 = arith.constant 0 : index
      %c0_65 = arith.constant 0 : index
      %109 = vector.load %arg6[%c0_64, %c0_65] : memref<8x128xf32, #tpu.memory_space<vmem>>, vector<8x128xf32>
      %110 = arith.index_cast %108 : i32 to index
      %c0_66 = arith.constant 0 : index
      %c0_67 = arith.constant 0 : index
      %111 = vector.load %arg1[%110, %c0_66, %c0_67] : memref<8x8x128xf32, #tpu.memory_space<vmem>>, vector<1x8x128xf32>
      %112 = vector.shape_cast %111 : vector<1x8x128xf32> to vector<8x128xf32>
      %113 = vector.extract_strided_slice %109 {offsets = [0, 0], sizes = [1, 128], strides = [1, 1]} : vector<8x128xf32> to vector<1x128xf32>
      %114 = vector.shape_cast %113 : vector<1x128xf32> to vector<1x128xf32>
      %115 = vector.broadcast %114 : vector<1x128xf32> to vector<8x128xf32>
      %c0_68 = arith.constant 0 : index
      %c0_69 = arith.constant 0 : index
      %c0_70 = arith.constant 0 : index
      %116 = vector.load %arg9[%c0_68, %c0_69, %c0_70] : memref<8x8x128xf32, #tpu.memory_space<vmem>>, vector<1x8x128xf32>
      %117 = vector.shape_cast %116 : vector<1x8x128xf32> to vector<8x128xf32>
      %118 = arith.addf %115, %117 : vector<8x128xf32>
      %119 = arith.addf %118, %112 : vector<8x128xf32>
      %120 = vector.extract_strided_slice %109 {offsets = [1, 0], sizes = [1, 128], strides = [1, 1]} : vector<8x128xf32> to vector<1x128xf32>
      %121 = vector.shape_cast %120 : vector<1x128xf32> to vector<1x128xf32>
      %122 = vector.broadcast %121 : vector<1x128xf32> to vector<8x128xf32>
      %c1_71 = arith.constant 1 : index
      %c0_72 = arith.constant 0 : index
      %c0_73 = arith.constant 0 : index
      %123 = vector.load %arg9[%c1_71, %c0_72, %c0_73] : memref<8x8x128xf32, #tpu.memory_space<vmem>>, vector<1x8x128xf32>
      %124 = vector.shape_cast %123 : vector<1x8x128xf32> to vector<8x128xf32>
      %125 = arith.addf %122, %124 : vector<8x128xf32>
      %126 = arith.addf %125, %112 : vector<8x128xf32>
      %127 = vector.extract_strided_slice %109 {offsets = [2, 0], sizes = [1, 128], strides = [1, 1]} : vector<8x128xf32> to vector<1x128xf32>
      %128 = vector.shape_cast %127 : vector<1x128xf32> to vector<1x128xf32>
      %129 = vector.broadcast %128 : vector<1x128xf32> to vector<8x128xf32>
      %c2_74 = arith.constant 2 : index
      %c0_75 = arith.constant 0 : index
      %c0_76 = arith.constant 0 : index
      %130 = vector.load %arg9[%c2_74, %c0_75, %c0_76] : memref<8x8x128xf32, #tpu.memory_space<vmem>>, vector<1x8x128xf32>
      %131 = vector.shape_cast %130 : vector<1x8x128xf32> to vector<8x128xf32>
      %132 = arith.addf %129, %131 : vector<8x128xf32>
      %133 = arith.addf %132, %112 : vector<8x128xf32>
      %134 = vector.extract_strided_slice %109 {offsets = [3, 0], sizes = [1, 128], strides = [1, 1]} : vector<8x128xf32> to vector<1x128xf32>
      %135 = vector.shape_cast %134 : vector<1x128xf32> to vector<1x128xf32>
      %136 = vector.broadcast %135 : vector<1x128xf32> to vector<8x128xf32>
      %c3_77 = arith.constant 3 : index
      %c0_78 = arith.constant 0 : index
      %c0_79 = arith.constant 0 : index
      %137 = vector.load %arg9[%c3_77, %c0_78, %c0_79] : memref<8x8x128xf32, #tpu.memory_space<vmem>>, vector<1x8x128xf32>
      %138 = vector.shape_cast %137 : vector<1x8x128xf32> to vector<8x128xf32>
      %139 = arith.addf %136, %138 : vector<8x128xf32>
      %140 = arith.addf %139, %112 : vector<8x128xf32>
      %141 = vector.extract_strided_slice %109 {offsets = [4, 0], sizes = [1, 128], strides = [1, 1]} : vector<8x128xf32> to vector<1x128xf32>
      %142 = vector.shape_cast %141 : vector<1x128xf32> to vector<1x128xf32>
      %143 = vector.broadcast %142 : vector<1x128xf32> to vector<8x128xf32>
      %c4_80 = arith.constant 4 : index
      %c0_81 = arith.constant 0 : index
      %c0_82 = arith.constant 0 : index
      %144 = vector.load %arg9[%c4_80, %c0_81, %c0_82] : memref<8x8x128xf32, #tpu.memory_space<vmem>>, vector<1x8x128xf32>
      %145 = vector.shape_cast %144 : vector<1x8x128xf32> to vector<8x128xf32>
      %146 = arith.addf %143, %145 : vector<8x128xf32>
      %147 = arith.addf %146, %112 : vector<8x128xf32>
      %148 = vector.extract_strided_slice %109 {offsets = [5, 0], sizes = [1, 128], strides = [1, 1]} : vector<8x128xf32> to vector<1x128xf32>
      %149 = vector.shape_cast %148 : vector<1x128xf32> to vector<1x128xf32>
      %150 = vector.broadcast %149 : vector<1x128xf32> to vector<8x128xf32>
      %c5_83 = arith.constant 5 : index
      %c0_84 = arith.constant 0 : index
      %c0_85 = arith.constant 0 : index
      %151 = vector.load %arg9[%c5_83, %c0_84, %c0_85] : memref<8x8x128xf32, #tpu.memory_space<vmem>>, vector<1x8x128xf32>
      %152 = vector.shape_cast %151 : vector<1x8x128xf32> to vector<8x128xf32>
      %153 = arith.addf %150, %152 : vector<8x128xf32>
      %154 = arith.addf %153, %112 : vector<8x128xf32>
      %155 = vector.extract_strided_slice %109 {offsets = [6, 0], sizes = [1, 128], strides = [1, 1]} : vector<8x128xf32> to vector<1x128xf32>
      %156 = vector.shape_cast %155 : vector<1x128xf32> to vector<1x128xf32>
      %157 = vector.broadcast %156 : vector<1x128xf32> to vector<8x128xf32>
      %c6_86 = arith.constant 6 : index
      %c0_87 = arith.constant 0 : index
      %c0_88 = arith.constant 0 : index
      %158 = vector.load %arg9[%c6_86, %c0_87, %c0_88] : memref<8x8x128xf32, #tpu.memory_space<vmem>>, vector<1x8x128xf32>
      %159 = vector.shape_cast %158 : vector<1x8x128xf32> to vector<8x128xf32>
      %160 = arith.addf %157, %159 : vector<8x128xf32>
      %161 = arith.addf %160, %112 : vector<8x128xf32>
      %162 = vector.extract_strided_slice %109 {offsets = [7, 0], sizes = [1, 128], strides = [1, 1]} : vector<8x128xf32> to vector<1x128xf32>
      %163 = vector.shape_cast %162 : vector<1x128xf32> to vector<1x128xf32>
      %164 = vector.broadcast %163 : vector<1x128xf32> to vector<8x128xf32>
      %c7_89 = arith.constant 7 : index
      %c0_90 = arith.constant 0 : index
      %c0_91 = arith.constant 0 : index
      %165 = vector.load %arg9[%c7_89, %c0_90, %c0_91] : memref<8x8x128xf32, #tpu.memory_space<vmem>>, vector<1x8x128xf32>
      %166 = vector.shape_cast %165 : vector<1x8x128xf32> to vector<8x128xf32>
      %167 = arith.addf %164, %166 : vector<8x128xf32>
      %168 = arith.addf %167, %112 : vector<8x128xf32>
      %169 = arith.cmpf ogt, %126, %119 : vector<8x128xf32>
      %170 = arith.select %169, %126, %119 : vector<8x128xi1>, vector<8x128xf32>
      %c1_i32_92 = arith.constant 1 : i32
      %c0_i32_93 = arith.constant 0 : i32
      %171 = vector.broadcast %c1_i32_92 : i32 to vector<8x128xi32>
      %172 = vector.broadcast %c0_i32_93 : i32 to vector<8x128xi32>
      %173 = arith.select %169, %171, %172 : vector<8x128xi1>, vector<8x128xi32>
      %174 = arith.cmpf ogt, %140, %133 : vector<8x128xf32>
      %175 = arith.select %174, %140, %133 : vector<8x128xi1>, vector<8x128xf32>
      %c3_i32_94 = arith.constant 3 : i32
      %c2_i32_95 = arith.constant 2 : i32
      %176 = vector.broadcast %c3_i32_94 : i32 to vector<8x128xi32>
      %177 = vector.broadcast %c2_i32_95 : i32 to vector<8x128xi32>
      %178 = arith.select %174, %176, %177 : vector<8x128xi1>, vector<8x128xi32>
      %179 = arith.cmpf ogt, %154, %147 : vector<8x128xf32>
      %180 = arith.select %179, %154, %147 : vector<8x128xi1>, vector<8x128xf32>
      %c5_i32_96 = arith.constant 5 : i32
      %c4_i32_97 = arith.constant 4 : i32
      %181 = vector.broadcast %c5_i32_96 : i32 to vector<8x128xi32>
      %182 = vector.broadcast %c4_i32_97 : i32 to vector<8x128xi32>
      %183 = arith.select %179, %181, %182 : vector<8x128xi1>, vector<8x128xi32>
      %184 = arith.cmpf ogt, %168, %161 : vector<8x128xf32>
      %185 = arith.select %184, %168, %161 : vector<8x128xi1>, vector<8x128xf32>
      %c7_i32_98 = arith.constant 7 : i32
      %c6_i32_99 = arith.constant 6 : i32
      %186 = vector.broadcast %c7_i32_98 : i32 to vector<8x128xi32>
      %187 = vector.broadcast %c6_i32_99 : i32 to vector<8x128xi32>
      %188 = arith.select %184, %186, %187 : vector<8x128xi1>, vector<8x128xi32>
      %189 = arith.cmpf ogt, %175, %170 : vector<8x128xf32>
      %190 = arith.select %189, %175, %170 : vector<8x128xi1>, vector<8x128xf32>
      %191 = arith.select %189, %178, %173 : vector<8x128xi1>, vector<8x128xi32>
      %192 = arith.cmpf ogt, %185, %180 : vector<8x128xf32>
      %193 = arith.select %192, %185, %180 : vector<8x128xi1>, vector<8x128xf32>
      %194 = arith.select %192, %188, %183 : vector<8x128xi1>, vector<8x128xi32>
      %195 = arith.cmpf ogt, %193, %190 : vector<8x128xf32>
      %196 = arith.select %195, %193, %190 : vector<8x128xi1>, vector<8x128xf32>
      %197 = arith.select %195, %194, %191 : vector<8x128xi1>, vector<8x128xi32>
      %198 = arith.index_cast %108 : i32 to index
      %c0_100 = arith.constant 0 : index
      %c0_101 = arith.constant 0 : index
      %199 = vector.load %arg7[%198, %c0_100, %c0_101] : memref<8x8x128xi32, #tpu.memory_space<vmem>>, vector<1x8x128xi32>
      %200 = vector.shape_cast %199 : vector<1x8x128xi32> to vector<8x128xi32>
      %201 = vector.shape_cast %197 : vector<8x128xi32> to vector<1x8x128xi32>
      tpu.vector_store %arg7[%198, %c0_100, %c0_101], %201 {strides = array<i32>} : memref<8x8x128xi32, #tpu.memory_space<vmem>>, vector<1x8x128xi32>,
      %202 = arith.index_cast %108 : i32 to index
      %c0_102 = arith.constant 0 : index
      %c0_103 = arith.constant 0 : index
      %203 = vector.load %arg2[%202, %c0_102, %c0_103] : memref<8x1x128xf32, #tpu.memory_space<vmem>>, vector<1x1x128xf32>
      %204 = vector.shape_cast %203 : vector<1x1x128xf32> to vector<1x128xf32>
      %cst = arith.constant 0.000000e+00 : f32
      %205 = vector.broadcast %cst : f32 to vector<1x128xf32>
      %206 = arith.cmpf ogt, %204, %205 : vector<1x128xf32>
      %207 = vector.shape_cast %206 : vector<1x128xi1> to vector<1x128xi1>
      %208 = vector.broadcast %207 : vector<1x128xi1> to vector<8x128xi1>
      %209 = arith.select %208, %196, %109 : vector<8x128xi1>, vector<8x128xf32>
      %c0_104 = arith.constant 0 : index
      %c0_105 = arith.constant 0 : index
      %210 = vector.load %arg6[%c0_104, %c0_105] : memref<8x128xf32, #tpu.memory_space<vmem>>, vector<8x128xf32>
      tpu.vector_store %arg6[%c0_104, %c0_105], %209 {strides = array<i32>} : memref<8x128xf32, #tpu.memory_space<vmem>>, vector<8x128xf32>,
    }
    %c7_i32_45 = arith.constant 7 : i32
    %c0_46 = arith.constant 0 : index
    %c0_47 = arith.constant 0 : index
    %60 = vector.load %arg6[%c0_46, %c0_47] : memref<8x128xf32, #tpu.memory_space<vmem>>, vector<8x128xf32>
    %c0_48 = arith.constant 0 : index
    %c0_49 = arith.constant 0 : index
    %61 = vector.load %arg4[%c0_48, %c0_49] : memref<8x1xf32, #tpu.memory_space<vmem>>, vector<8x1xf32>
    %62 = vector.shape_cast %61 : vector<8x1xf32> to vector<8x1xf32>
    %63 = vector.broadcast %62 : vector<8x1xf32> to vector<8x128xf32>
    %64 = arith.addf %60, %63 : vector<8x128xf32>
    %65 = vector.extract_strided_slice %64 {offsets = [0, 0], sizes = [1, 128], strides = [1, 1]} : vector<8x128xf32> to vector<1x128xf32>
    %66 = vector.extract_strided_slice %64 {offsets = [1, 0], sizes = [1, 128], strides = [1, 1]} : vector<8x128xf32> to vector<1x128xf32>
    %67 = vector.extract_strided_slice %64 {offsets = [2, 0], sizes = [1, 128], strides = [1, 1]} : vector<8x128xf32> to vector<1x128xf32>
    %68 = vector.extract_strided_slice %64 {offsets = [3, 0], sizes = [1, 128], strides = [1, 1]} : vector<8x128xf32> to vector<1x128xf32>
    %69 = vector.extract_strided_slice %64 {offsets = [4, 0], sizes = [1, 128], strides = [1, 1]} : vector<8x128xf32> to vector<1x128xf32>
    %70 = vector.extract_strided_slice %64 {offsets = [5, 0], sizes = [1, 128], strides = [1, 1]} : vector<8x128xf32> to vector<1x128xf32>
    %71 = vector.extract_strided_slice %64 {offsets = [6, 0], sizes = [1, 128], strides = [1, 1]} : vector<8x128xf32> to vector<1x128xf32>
    %72 = vector.extract_strided_slice %64 {offsets = [7, 0], sizes = [1, 128], strides = [1, 1]} : vector<8x128xf32> to vector<1x128xf32>
    %73 = arith.cmpf ogt, %66, %65 : vector<1x128xf32>
    %74 = arith.select %73, %66, %65 : vector<1x128xi1>, vector<1x128xf32>
    %c1_i32_50 = arith.constant 1 : i32
    %c0_i32_51 = arith.constant 0 : i32
    %75 = vector.broadcast %c1_i32_50 : i32 to vector<1x128xi32>
    %76 = vector.broadcast %c0_i32_51 : i32 to vector<1x128xi32>
    %77 = arith.select %73, %75, %76 : vector<1x128xi1>, vector<1x128xi32>
    %78 = arith.cmpf ogt, %68, %67 : vector<1x128xf32>
    %79 = arith.select %78, %68, %67 : vector<1x128xi1>, vector<1x128xf32>
    %c3_i32 = arith.constant 3 : i32
    %c2_i32 = arith.constant 2 : i32
    %80 = vector.broadcast %c3_i32 : i32 to vector<1x128xi32>
    %81 = vector.broadcast %c2_i32 : i32 to vector<1x128xi32>
    %82 = arith.select %78, %80, %81 : vector<1x128xi1>, vector<1x128xi32>
    %83 = arith.cmpf ogt, %70, %69 : vector<1x128xf32>
    %84 = arith.select %83, %70, %69 : vector<1x128xi1>, vector<1x128xf32>
    %c5_i32 = arith.constant 5 : i32
    %c4_i32 = arith.constant 4 : i32
    %85 = vector.broadcast %c5_i32 : i32 to vector<1x128xi32>
    %86 = vector.broadcast %c4_i32 : i32 to vector<1x128xi32>
    %87 = arith.select %83, %85, %86 : vector<1x128xi1>, vector<1x128xi32>
    %88 = arith.cmpf ogt, %72, %71 : vector<1x128xf32>
    %89 = arith.select %88, %72, %71 : vector<1x128xi1>, vector<1x128xf32>
    %c7_i32_52 = arith.constant 7 : i32
    %c6_i32 = arith.constant 6 : i32
    %90 = vector.broadcast %c7_i32_52 : i32 to vector<1x128xi32>
    %91 = vector.broadcast %c6_i32 : i32 to vector<1x128xi32>
    %92 = arith.select %88, %90, %91 : vector<1x128xi1>, vector<1x128xi32>
    %93 = arith.cmpf ogt, %79, %74 : vector<1x128xf32>
    %94 = arith.select %93, %79, %74 : vector<1x128xi1>, vector<1x128xf32>
    %95 = arith.select %93, %82, %77 : vector<1x128xi1>, vector<1x128xi32>
    %96 = arith.cmpf ogt, %89, %84 : vector<1x128xf32>
    %97 = arith.select %96, %89, %84 : vector<1x128xi1>, vector<1x128xf32>
    %98 = arith.select %96, %92, %87 : vector<1x128xi1>, vector<1x128xi32>
    %99 = arith.cmpf ogt, %97, %94 : vector<1x128xf32>
    %100 = arith.select %99, %98, %95 : vector<1x128xi1>, vector<1x128xi32>
    %c0_53 = arith.constant 0 : index
    %c0_54 = arith.constant 0 : index
    %101 = vector.load %arg8[%c0_53, %c0_54] : memref<1x128xi32, #tpu.memory_space<vmem>>, vector<1x128xi32>
    tpu.vector_store %arg8[%c0_53, %c0_54], %100 {strides = array<i32>} : memref<1x128xi32, #tpu.memory_space<vmem>>, vector<1x128xi32>,
    %c7_55 = arith.constant 7 : index
    %c0_56 = arith.constant 0 : index
    %c0_57 = arith.constant 0 : index
    %102 = vector.load %arg5[%c7_55, %c0_56, %c0_57] : memref<8x1x128xi32, #tpu.memory_space<vmem>>, vector<1x1x128xi32>
    %103 = vector.shape_cast %102 : vector<1x1x128xi32> to vector<1x128xi32>
    %104 = vector.shape_cast %100 : vector<1x128xi32> to vector<1x1x128xi32>
    tpu.vector_store %arg5[%c7_55, %c0_56, %c0_57], %104 {strides = array<i32>} : memref<8x1x128xi32, #tpu.memory_space<vmem>>, vector<1x1x128xi32>,
    %105 = tpu.iota {dimensions = array<i32: 0>} : vector<8x128xi32>
    %c0_i32_58 = arith.constant 0 : i32
    %c7_i32_59 = arith.constant 7 : i32
    %106 = arith.addi %c0_i32_58, %c7_i32_59 : i32
    %c1_i32_60 = arith.constant 1 : i32
    scf.for %arg10 = %c0_i32_58 to %106 step %c1_i32_60  : i32 {
      %c1_i32_62 = arith.constant 1 : i32
      %107 = arith.muli %arg10, %c1_i32_62 : i32
      %c0_i32_63 = arith.constant 0 : i32
      %108 = arith.addi %c0_i32_63, %107 : i32
      %c6_i32_64 = arith.constant 6 : i32
      %109 = arith.subi %c6_i32_64, %108 : i32
      %c0_65 = arith.constant 0 : index
      %c0_66 = arith.constant 0 : index
      %110 = vector.load %arg8[%c0_65, %c0_66] : memref<1x128xi32, #tpu.memory_space<vmem>>, vector<1x128xi32>
      %c1_i32_67 = arith.constant 1 : i32
      %111 = arith.addi %109, %c1_i32_67 : i32
      %112 = arith.index_cast %111 : i32 to index
      %c0_68 = arith.constant 0 : index
      %c0_69 = arith.constant 0 : index
      %113 = vector.load %arg7[%112, %c0_68, %c0_69] : memref<8x8x128xi32, #tpu.memory_space<vmem>>, vector<1x8x128xi32>
      %114 = vector.shape_cast %113 : vector<1x8x128xi32> to vector<8x128xi32>
      %115 = vector.broadcast %110 : vector<1x128xi32> to vector<8x128xi32>
      %116 = arith.cmpi eq, %105, %115 : vector<8x128xi32>
      %c0_i32_70 = arith.constant 0 : i32
      %117 = vector.broadcast %c0_i32_70 : i32 to vector<8x128xi32>
      %118 = arith.select %116, %114, %117 : vector<8x128xi1>, vector<8x128xi32>
      %cst = arith.constant dense<0> : vector<128xi32>
      %119 = vector.multi_reduction <add>, %118, %cst [0] : vector<8x128xi32> to vector<128xi32>
      %120 = vector.shape_cast %119 : vector<128xi32> to vector<1x128xi32>
      %c0_71 = arith.constant 0 : index
      %c0_72 = arith.constant 0 : index
      %121 = vector.load %arg8[%c0_71, %c0_72] : memref<1x128xi32, #tpu.memory_space<vmem>>, vector<1x128xi32>
      tpu.vector_store %arg8[%c0_71, %c0_72], %120 {strides = array<i32>} : memref<1x128xi32, #tpu.memory_space<vmem>>, vector<1x128xi32>,
      %122 = arith.index_cast %109 : i32 to index
      %c0_73 = arith.constant 0 : index
      %c0_74 = arith.constant 0 : index
      %123 = vector.load %arg5[%122, %c0_73, %c0_74] : memref<8x1x128xi32, #tpu.memory_space<vmem>>, vector<1x1x128xi32>
      %124 = vector.shape_cast %123 : vector<1x1x128xi32> to vector<1x128xi32>
      %125 = vector.shape_cast %120 : vector<1x128xi32> to vector<1x1x128xi32>
      tpu.vector_store %arg5[%122, %c0_73, %c0_74], %125 {strides = array<i32>} : memref<8x1x128xi32, #tpu.memory_space<vmem>>, vector<1x1x128xi32>,
    }
    %c7_i32_61 = arith.constant 7 : i32
    return
  }
  func.func @transform_0(%arg0: i32) -> (i32, i32, i32) {
    %c0_i32 = arith.constant 0 : i32
    %c0_i32_0 = arith.constant 0 : i32
    %c0_i32_1 = arith.constant 0 : i32
    return %c0_i32, %c0_i32_0, %arg0 : i32, i32, i32
  }
  func.func @transform_1(%arg0: i32) -> (i32, i32, i32) {
    %c0_i32 = arith.constant 0 : i32
    %c0_i32_0 = arith.constant 0 : i32
    %c0_i32_1 = arith.constant 0 : i32
    return %c0_i32, %c0_i32_0, %arg0 : i32, i32, i32
  }
  func.func @transform_2(%arg0: i32) -> (i32, i32, i32) {
    %c0_i32 = arith.constant 0 : i32
    %c0_i32_0 = arith.constant 0 : i32
    %c0_i32_1 = arith.constant 0 : i32
    %c0_i32_2 = arith.constant 0 : i32
    return %c0_i32, %c0_i32_0, %c0_i32_1 : i32, i32, i32
  }
  func.func @transform_3(%arg0: i32) -> (i32, i32) {
    %c0_i32 = arith.constant 0 : i32
    %c0_i32_0 = arith.constant 0 : i32
    %c0_i32_1 = arith.constant 0 : i32
    return %c0_i32, %c0_i32_0 : i32, i32
  }
  func.func @transform_4(%arg0: i32) -> (i32, i32, i32) {
    %c0_i32 = arith.constant 0 : i32
    %c0_i32_0 = arith.constant 0 : i32
    %c0_i32_1 = arith.constant 0 : i32
    return %c0_i32, %c0_i32_0, %arg0 : i32, i32, i32
  }
}

</mosaic_0001>

<bundles_post_ra>
// kernel: tpu_custom_call.1
= control target key start
LH: loop header
LB: loop body
LE: loop exit
PB: predicated region body
PF: predicated region fallthrough
CT: control target
= control target key end

     0   :  { %v376_v2 = vmov 0   ;;  %s518_s0 = inlined_call_operand.vmem [shape: f32[8,8,128], index: 0, kind: input, shape index: {}]   ;;  %s519_s1 = inlined_call_operand.vmem [shape: f32[8,1,128], index: 1, kind: input, shape index: {}]   ;;  %s520_s2 = inlined_call_operand.vmem [shape: f32[8,8,1], index: 2, kind: input, shape index: {}]   ;;  %s521_s3 = inlined_call_operand.vmem [shape: f32[8,1], index: 3, kind: input, shape index: {}]   ;;  %s522_s4 = inlined_call_operand.hbm [shape: s32[8,1,128], index: 4, kind: output, shape index: {}]  }
   0x1   :  { %v293_v0 = vld [vmem:[%s520_s2 + $0x10] sm:$0xff]  ;;  %v18_v1 = vld [vmem:[%s520_s2] sm:$0xff]  ;;  %334 = vset.pattern.permute.xlu1 %v376_v2  ;;  %333 = vset.pattern.permute.xlu0 %v376_v2 }
   0x2   :  { %38 = vperm.xlu1 %334, %v293_v0   ;;  %21 = vperm.xlu0 %333, %v18_v1  }
   0x3   :  { %9 = vsyncpa [#allocation7], 0  ;;  %v294_v3 = vld [vmem:[%s520_s2 + $0x18] sm:$0xff]  ;;  %v292_v4 = vld [vmem:[%s520_s2 + $0x8] sm:$0xff] }
   0x4   :  { %v296_v5 = vld [vmem:[%s520_s2 + $0x28] sm:$0xff]  ;;  %v295_v6 = vld [vmem:[%s520_s2 + $0x20] sm:$0xff]  ;;  %v298_v7 = vld [vmem:[%s520_s2 + $0x38] sm:$0xff] }
   0x5   :  { %v297_v8 = vld [vmem:[%s520_s2 + $0x30] sm:$0xff]  ;;  %v88_v9 = vld [vmem:[%s518_s0] sm:$0xff]  ;;  %s441_s2 = smov 0  }
   0x6   :  { %47 = vperm.xlu1 %334, %v294_v3   ;;  %29 = vperm.xlu0 %333, %v292_v4   ;;  %89 = vst [vmem:[#allocation2] sm:$0xff] %v88_v9 }
   0xa   :  { %65 = vperm.xlu1 %334, %v296_v5   ;;  %56 = vperm.xlu0 %333, %v295_v6  }
   0xe   :  { %83 = vperm.xlu1 %334, %v298_v7   ;;  %74 = vperm.xlu0 %333, %v297_v8  }
  0x81   :  { %v39_v10 = vpop.permute.xlu1 %38  ;;  %v22_v11 = vpop.permute.xlu0 %21 }
  0x82   :  { %42 = vst [vmem:[#allocation5 + $0x10] sm:$0xff] %v39_v10  ;;  %24 = vst [vmem:[#allocation5] sm:$0xff] %v22_v11 }
  0x85   :  { %v48_v12 = vpop.permute.xlu1 %47  ;;  %v30_v13 = vpop.permute.xlu0 %29 }
  0x86   :  { %51 = vst [vmem:[#allocation5 + $0x18] sm:$0xff] %v48_v12  ;;  %33 = vst [vmem:[#allocation5 + $0x8] sm:$0xff] %v30_v13 }
  0x89   :  { %v66_v14 = vpop.permute.xlu1 %65  ;;  %v57_v15 = vpop.permute.xlu0 %56 }
  0x8a   :  { %69 = vst [vmem:[#allocation5 + $0x28] sm:$0xff] %v66_v14  ;;  %60 = vst [vmem:[#allocation5 + $0x20] sm:$0xff] %v57_v15 }
  0x8d   :  { %v84_v16 = vpop.permute.xlu1 %83  ;;  %v75_v17 = vpop.permute.xlu0 %74 }
  0x8e   :  { %87 = vst [vmem:[#allocation5 + $0x38] sm:$0xff] %v84_v16  ;;  %78 = vst [vmem:[#allocation5 + $0x30] sm:$0xff] %v75_v17 }
  0x8f LB: > { %v101_v18 = vlaneseq  ;;  %s299_s7 = sshll.u32 %s370_s2, 3  ;;  %v449_v20 = vld [vmem:[#allocation2] sm:$0xff]  ;;  %v105_v21 = vld [vmem:[#allocation5] sm:$0xff]  ;;  %v112_v24 = vld [vmem:[#allocation5 + $0x8] sm:$0xff]  ;;  %s277_s13 = scalar_lea.vmem %s519_s1, %s370_s2  ;;  %v377_v0 = vmov 0   ;;  %v378_v4 = vmov 2   ;;  %s370_s2 = sphi %s441_s2, %s95_s2  }
  0x90   : > { %s272_s10 = scalar_lea.vmem %s518_s0, %s299_s7  ;;  %v119_v26 = vld [vmem:[#allocation5 + $0x10] sm:$0xff]  ;;  %v126_v28 = vld [vmem:[#allocation5 + $0x18] sm:$0xff]  ;;  %v379_v8 = vmov 4   ;;  %v380_v11 = vmov 6   ;;  %s275_s14 = scalar_lea.vmem [#allocation3], %s299_s7 }
  0x91   : > { %v447_v19 = vshrl.u32 %v101_v18, 7  ;;  %v133_v30 = vld [vmem:[#allocation5 + $0x20] sm:$0xff]  ;;  %v140_v38 = vld [vmem:[#allocation5 + $0x28] sm:$0xff]  ;;  %v303_v54 = vld [vmem:[%s277_s13 + $0x1] sm:$0x1]  ;;  %s95_s2 = sadd.s32 1, %s370_s2  }
  0x92   : > { %v300_v41 = vld [vmem:[%s272_s10 + $0x8] sm:$0xff]  ;;  %vm182_vm2 = vcmp.gt.f32.partialorder %v303_v54, 0.0  ;;  %p92_p0 = scmp.ge.s32.totalorder %s95_s2, 7  }
  0x93   : > { %v103_v22 = vsub.s32 0, %v447_v19  ;;  %v110_v23 = vsub.s32 1, %v447_v19  ;;  %v117_v25 = vsub.s32 2, %v447_v19  ;;  %v124_v27 = vsub.s32 3, %v447_v19  ;;  %335 = vset.pattern.permute.xlu0 (%p92_p0), %v376_v2  ;;  %s372_s0 = smov (%p92_p0), 0  }
  0x94   : > { %v131_v29 = vsub.s32 4, %v447_v19  ;;  %v138_v31 = vsub.s32 5, %v447_v19  ;;  %v145_v32 = vsub.s32 6, %v447_v19  ;;  %v152_v33 = vsub.s32 7, %v447_v19 }
  0x95   : > { %v104_v34 = vrot.slane %v449_v20, %v103_v22  ;;  %v111_v35 = vrot.slane %v449_v20, %v110_v23  ;;  %v118_v36 = vrot.slane %v449_v20, %v117_v25  ;;  %v125_v37 = vrot.slane %v449_v20, %v124_v27  ;;  %v147_v39 = vld [vmem:[#allocation5 + $0x30] sm:$0xff]  ;;  %v154_v40 = vld [vmem:[#allocation5 + $0x38] sm:$0xff] }
  0x96   : > { %v132_v42 = vrot.slane %v449_v20, %v131_v29  ;;  %v139_v43 = vrot.slane %v449_v20, %v138_v31  ;;  %v146_v44 = vrot.slane %v449_v20, %v145_v32  ;;  %v153_v45 = vrot.slane %v449_v20, %v152_v33 }
  0x97   : > { %v106_v46 = vadd.f32 %v105_v21, %v104_v34  ;;  %v113_v47 = vadd.f32 %v112_v24, %v111_v35  ;;  %v120_v48 = vadd.f32 %v119_v26, %v118_v36  ;;  %v127_v49 = vadd.f32 %v126_v28, %v125_v37 }
  0x98   : > { %v134_v50 = vadd.f32 %v133_v30, %v132_v42  ;;  %v141_v51 = vadd.f32 %v140_v38, %v139_v43  ;;  %v148_v52 = vadd.f32 %v147_v39, %v146_v44  ;;  %v155_v53 = vadd.f32 %v154_v40, %v153_v45 }
  0x99   : > { %v107_v55 = vadd.f32 %v300_v41, %v106_v46  ;;  %v114_v56 = vadd.f32 %v300_v41, %v113_v47  ;;  %v121_v57 = vadd.f32 %v300_v41, %v120_v48  ;;  %v128_v58 = vadd.f32 %v300_v41, %v127_v49 }
  0x9a   : > { %v135_v59 = vadd.f32 %v300_v41, %v134_v50  ;;  %v142_v60 = vadd.f32 %v300_v41, %v141_v51  ;;  %v149_v61 = vadd.f32 %v300_v41, %v148_v52  ;;  %v156_v62 = vadd.f32 %v300_v41, %v155_v53 }
  0x9b   : > { %vm157_vm0 = vcmp.gt.f32.partialorder %v114_v56, %v107_v55  ;;  %vm160_vm1 = vcmp.gt.f32.partialorder %v128_v58, %v121_v57  ;;  %v183_v6 = vsel %vm182_vm2, 1, %v377_v0  ;;  %v381_v30 = vmov (%p92_p0), 4  }
  0x9c   : > { %v158_v63 = vsel %vm157_vm0, %v114_v56, %v107_v55  ;;  %v159_v1 = vsel %vm157_vm0, 1, %v377_v0  ;;  %v161_v3 = vsel %vm160_vm1, %v128_v58, %v121_v57  ;;  %v162_v5 = vsel %vm160_vm1, 3, %v378_v4 }
  0x9d   : > { %vm163_vm3 = vcmp.gt.f32.partialorder %v142_v60, %v135_v59  ;;  %vm166_vm4 = vcmp.gt.f32.partialorder %v156_v62, %v149_v61  ;;  %vm169_vm5 = vcmp.gt.f32.partialorder %v161_v3, %v158_v63  ;;  %v187_v15 = vrot.slane %v183_v6, %v103_v22  ;;  %v192_v22 = vld [vmem:[%s521_s3] sm:$0xff] (%p92_p0) }
  0x9e   : > { %v164_v7 = vsel %vm163_vm3, %v142_v60, %v135_v59  ;;  %v165_v9 = vsel %vm163_vm3, 5, %v379_v8  ;;  %v167_v10 = vsel %vm166_vm4, %v156_v62, %v149_v61  ;;  %v168_v12 = vsel %vm166_vm4, 7, %v380_v11  ;;  %94 = sbr.rel (!%p92_p0) target bundleno = 143 (0x8f), region = 70  ;;  %195 = vperm.xlu0 (%p92_p0), %335, %v192_v22  }
  0x9f   : > { %v170_v13 = vsel %vm169_vm5, %v161_v3, %v158_v63  ;;  %v171_v14 = vsel %vm169_vm5, %v162_v5, %v159_v1  ;;  %vm172_vm6 = vcmp.gt.f32.partialorder %v167_v10, %v164_v7  ;;  %vm188_vm8 = vcmp.eq.s32.totalorder %v187_v15, 1 }
  0xa0   : > { %v173_v16 = vsel %vm172_vm6, %v167_v10, %v164_v7  ;;  %v174_v17 = vsel %vm172_vm6, %v168_v12, %v165_v9  ;;  %v382_v34 = vmov (%p92_p0), 2   ;;  %v383_v41 = vmov (%p92_p0), 6  }
  0xa1   : > { %vm175_vm7 = vcmp.gt.f32.partialorder %v173_v16, %v170_v13 }
  0xa2   : > { %v177_v18 = vsel %vm175_vm7, %v174_v17, %v171_v14  ;;  %v176_v21 = vsel %vm175_vm7, %v173_v16, %v170_v13 }
  0xa3   : > { %302 = vst [vmem:[%s275_s14 + $0x8] sm:$0xff] %v177_v18  ;;  %v189_v23 = vsel %vm188_vm8, %v176_v21, %v449_v20 }
  0xa4   : > { %190 = vst [vmem:[#allocation2] sm:$0xff] %v189_v23 }
  0xab   :  { %v191_v24 = vld [vmem:[#allocation2] sm:$0xff] }
 0x11d   :  { %v196_v25 = vpop.permute.xlu0 %195 }
 0x11e   :  { %v198_v26 = vadd.f32 %v196_v25, %v191_v24 }
 0x120   :  { %v200_v27 = vrot.slane %v198_v26, 7 }
 0x122   :  { %vm490_vm9 = vcmp.gt.f32.partialorder %v198_v26, %v200_v27 }
 0x123   :  { %v203_v28 = vsel %vm490_vm9, %v198_v26, %v200_v27  ;;  %v204_v29 = vsel %vm490_vm9, 1, %v376_v2  ;;  %v206_v31 = vsel %vm490_vm9, 5, %v381_v30  ;;  %v205_v35 = vsel %vm490_vm9, 3, %v382_v34 }
 0x124   :  { %v209_v32 = vrot.slane %v203_v28, 6  ;;  %v213_v33 = vrot.slane %v204_v29, 6  ;;  %v215_v36 = vrot.slane %v206_v31, 6  ;;  %v207_v2 = vsel %vm490_vm9, 7, %v383_v41 }
 0x126   :  { %vm211_vm10 = vcmp.gt.f32.partialorder %v203_v28, %v209_v32 }
 0x127   :  { %v212_v37 = vsel %vm211_vm10, %v203_v28, %v209_v32  ;;  %v214_v38 = vsel %vm211_vm10, %v205_v35, %v213_v33  ;;  %v216_v42 = vsel %vm211_vm10, %v207_v2, %v215_v36 }
 0x128   :  { %v218_v39 = vrot.slane %v212_v37, 4  ;;  %v221_v40 = vrot.slane %v214_v38, 4 }
 0x12a   :  { %vm220_vm11 = vcmp.gt.f32.partialorder %v212_v37, %v218_v39 }
 0x12b   :  { %v222_v43 = vsel %vm220_vm11, %v216_v42, %v221_v40 }
 0x12c   :  { %223 = vst [vmem:[#allocation4 - $0x7] sm:$0x80] %v222_v43  ;;  %225 = vst [vmem:[#allocation6] sm:$0x80] %v222_v43 }
 0x12d LB: > { %s236_s1 = ssub.s32 7, %s374_s0  ;;  %s234_s18 = ssub.s32 6, %s374_s0  ;;  %s374_s0 = sphi %s372_s0, %s233_s0  }
 0x12e   : > { %s304_s3 = sshll.u32 %s236_s1, 3  ;;  %s253_s19 = scalar_lea.vmem [#allocation6], %s234_s18 }
 0x12f   : > { %s238_s17 = scalar_lea.vmem [#allocation3], %s304_s3  ;;  %s233_s0 = sadd.s32 1, %s374_s0  }
 0x130   : > { %v239_v45 = vld [vmem:[%s238_s17] sm:$0xff]  ;;  %p230_p1 = scmp.ge.s32.totalorder %s233_s0, 7  }
 0x131   :  { %s384_s20 = smov (%p230_p1), [#allocation6]  }
 0x132   :  { %s260_s21 = sshll.u32 (%p230_p1), %s384_s20, 4  ;;  %s261_s21 = int_to_ptr.vmem [resolvable:$true] %s260_s21 }
 0x133   : > { %v305_v44 = vld [vmem:[#allocation4] ss:$0 sm:$0xff]  ;;  %s336_s22 = scalar_lea.vmem (%p230_p1), %s261_s21, 128  ;;  %p341_p3 = scmp.lt.s32.totalorder (%p230_p1), %s261_s21, %s261_s21 }
 0x134   : > { %vm244_vm12 = vcmp.eq.s32.totalorder %v447_v19, %v305_v44  ;;  %p337_p2 = scmp.ne.s32.totalorder (%p230_p1), %s261_s21, %s336_s22  ;;  %p342_p4 = scmp.lt.s32.totalorder (%p230_p1), %s336_s22, %s336_s22 }
 0x135   : > { %v245_v46 = vsel %vm244_vm12, %v239_v45, 0 }
 0x136   : > { %v246_v47 = vrot.slane %v245_v46, 4  ;;  %p343_p5 = por (%p230_p1), %p342_p4, %p341_p3 }
 0x138   : > { %v247_v48 = vadd.s32 %v246_v47, %v245_v46  ;;  %p344_p6 = pnand (%p230_p1), %p343_p5, %p337_p2 }
 0x13a   : > { %v248_v49 = vrot.slane %v247_v48, 2 }
 0x13c   : > { %v249_v50 = vadd.s32 %v248_v49, %v247_v48  ;;  %232 = sbr.rel (!%p230_p1) target bundleno = 301 (0x12d), region = 81 }
 0x13e   : > { %v250_v51 = vrot.slane %v249_v50, 1 }
 0x140   : > { %v251_v52 = vadd.s32 %v250_v51, %v249_v50 }
 0x142   : > { %252 = vst [vmem:[#allocation4] sm:$0x1] %v251_v52  ;;  %254 = vst [vmem:[%s253_s19] sm:$0x1] %v251_v52 }
 0x143   :  { %347 = shalt.err (!%p344_p6)
}
 0x144   :  { %s348_s25 = scalar_lea.hbm %s522_s4, 128 }
 0x145   :  { %p349_p7 = scmp.ne.s32.totalorder %s522_s4, %s348_s25  ;;  %p352_p8 = scmp.lt.u32.totalorder %s348_s25, %s522_s4 }
 0x147   :  { %p354_p9 = pnand %p352_p8, %p349_p7 }
 0x149   :  { %357 = shalt.err (!%p354_p9)
}
 0x14a   :  { %s385_s30 = smov 16   ;;  %s386_s5 = smov 1  }
 0x14b   :  { %266 = dma.vmem_to_hbm [thread:$0]  %s261_s21, 128, %s522_s4, [#allocation7], %s385_s30, %s385_s30, %s386_s5  }
 0x14c   :  { %366 = dma.done.wait [#allocation7], 128  }
 0x14d   :  { %367 = vsyncadd [#allocation7], 4294967168 }
 0x14e   :  { %270 = vsyncpa [#allocation7], 1 }

</bundles_post_ra>
